<compile_context>
chip_gen: v6e
topology: v6e:2x2x1
jax: 0.10.0
libtpu: 0.0.40
codegen_flags: <defaults>
</compile_context>

<pallas_src>
import functools

import jax
import jax.numpy as jnp
from jax.experimental import pallas as pl
from jax.experimental.pallas import tpu as pltpu


def _round_up(v, m):
    return ((v + m - 1) // m) * m


def _linear_softmax_kernel(x_ref, wt_ref, b_ref, o_ref, acc_ref):
    # x_ref:  (TB, TK)        activation tile (native dtype)
    # wt_ref: (TK, N_pad)     pre-transposed weight tile (native dtype)
    # b_ref:  (1,  N_pad)     bias row (padded cols hold a large negative)
    # o_ref:  (TB, N_pad)     output probabilities
    # acc_ref:(TB, N_pad)     f32 accumulator (persists across the K axis)
    k = pl.program_id(1)

    @pl.when(k == 0)
    def _():
        acc_ref[...] = jnp.zeros_like(acc_ref)

    # MXU matmul, native-dtype operands, f32 accumulation.
    acc_ref[...] += jnp.dot(
        x_ref[...], wt_ref[...], preferred_element_type=jnp.float32
    )

    @pl.when(k == pl.num_programs(1) - 1)
    def _():
        # Bias is added once, in the finalize (not per K step).
        logits = acc_ref[...] + b_ref[...].astype(jnp.float32)
        # Numerically-stable softmax over the (fully resident) output axis.
        m = jnp.max(logits, axis=-1, keepdims=True)
        e = jnp.exp(logits - m)
        denom = jnp.sum(e, axis=-1, keepdims=True)
        # Exact per-row division (one divide per row): matches F.softmax and
        # guarantees rows sum to 1 up to float rounding.
        probs = e / denom
        o_ref[...] = probs.astype(o_ref.dtype)


@functools.partial(jax.jit, static_argnames=())
def network_forward(x, weight, bias):
    """x: (B, D_in); weight: (D_out, D_in) [PyTorch layout]; bias: (D_out,).

    Returns softmax(x @ weight.T + bias, axis=-1) with shape (B, D_out).
    """
    B, D_in = x.shape
    D_out = weight.shape[0]

    # ---- tile sizes (multiples of (8, 128); re-derived from shapes) --------
    TB = min(256, _round_up(B, 8))          # batch rows per tile
    TK = min(512, _round_up(D_in, 128))     # reduction chunk
    B_pad = _round_up(B, TB)
    K_pad = _round_up(D_in, TK)
    N_pad = _round_up(max(D_out, 128), 128)  # lane-dense output width

    # ---- host-side (XLA) padding, done once per call ------------------------
    x_p = jnp.pad(x, ((0, B_pad - B), (0, K_pad - D_in)))
    # Pre-transpose the weight: (D_out, D_in) -> (D_in, D_out), then pad.
    wt_p = jnp.pad(weight.T, ((0, K_pad - D_in), (0, N_pad - D_out)))
    # Padded output columns get a large negative bias -> softmax prob == 0.
    neg = jnp.asarray(-1e30, dtype=bias.dtype)
    b_p = jnp.pad(bias.reshape(1, D_out), ((0, 0), (0, N_pad - D_out)),
                  constant_values=neg)

    grid = (B_pad // TB, K_pad // TK)

    # ---- explicit VMEM budget (double-buffered inputs + f32 accumulator) ----
    elt = jnp.dtype(x.dtype).itemsize
    vmem_est = (2 * TB * TK * elt            # x tiles
                + 2 * TK * N_pad * elt       # weight tiles
                + 2 * N_pad * elt            # bias row
                + 2 * TB * N_pad * elt       # output tiles
                + TB * N_pad * 4)            # accumulator
    vmem_limit = int(min(64 * 1024 * 1024,
                         max(2 * vmem_est, 16 * 1024 * 1024)))

    out_padded = pl.pallas_call(
        _linear_softmax_kernel,
        out_shape=jax.ShapeDtypeStruct((B_pad, N_pad), x.dtype),
        grid_spec=pltpu.PrefetchScalarGridSpec(
            num_scalar_prefetch=0,
            grid=grid,
            in_specs=[
                pl.BlockSpec((TB, TK), lambda i, k: (i, k)),       # x
                pl.BlockSpec((TK, N_pad), lambda i, k: (k, 0)),    # W^T
                pl.BlockSpec((1, N_pad), lambda i, k: (0, 0)),     # bias
            ],
            out_specs=pl.BlockSpec((TB, N_pad), lambda i, k: (i, 0)),
            scratch_shapes=[pltpu.VMEM((TB, N_pad), jnp.float32)],
        ),
        compiler_params=pltpu.CompilerParams(
            dimension_semantics=("parallel", "arbitrary"),
            vmem_limit_bytes=vmem_limit,
        ),
    )(x_p, wt_p, b_p)

    return out_padded[:B, :D_out]


def reference_forward(x, weight, bias):
    logits = x @ weight.T + bias
    return jax.nn.softmax(logits, axis=-1)


if __name__ == "__main__":
    key = jax.random.PRNGKey(0)
    k_x, k_w, k_b = jax.random.split(key, 3)

    batch = 2
    input_size = 32
    output_size = 8

    x = jax.random.normal(k_x, (batch, input_size), dtype=jnp.float32)
    # Deterministic parameter init (Kaiming-uniform-ish bound like nn.Linear).
    bound = 1.0 / (input_size ** 0.5)
    weight = jax.random.uniform(
        k_w, (output_size, input_size), minval=-bound, maxval=bound,
        dtype=jnp.float32)
    bias = jax.random.uniform(
        k_b, (output_size,), minval=-bound, maxval=bound, dtype=jnp.float32)

    out = network_forward(x, weight, bias)
    out = jax.block_until_ready(out)

    ref = reference_forward(x, weight, bias)
    assert out.shape == (batch, output_size)
    assert jnp.allclose(out, ref, atol=1e-4, rtol=1e-4), "mismatch vs reference"
    assert jnp.allclose(jnp.sum(out, axis=-1), 1.0, atol=1e-4), \
        "rows must sum to 1"

    print("KERNEL_OK")
</pallas_src>

<mosaic_0001>
module attributes {stable_mosaic.version = 11 : i64} {
  func.func @_linear_softmax_kernel(%arg0: i32, %arg1: i32, %arg2: memref<8x128xf32, #tpu.memory_space<vmem>>, %arg3: memref<128x128xf32, #tpu.memory_space<vmem>>, %arg4: memref<1x128xf32, #tpu.memory_space<vmem>>, %arg5: memref<8x128xf32, #tpu.memory_space<vmem>>, %arg6: memref<8x128xf32, #tpu.memory_space<vmem>>) attributes {dimension_semantics = [#tpu.dimension_semantics<parallel>, #tpu.dimension_semantics<arbitrary>], iteration_bounds = array<i64: 1, 1>, scalar_prefetch = 0 : i64, scratch_operands = 1 : i64, tpu.core_type = #tpu.core_type<tc>, window_params = [{transform_indices = @transform_0, window_bounds = array<i64: 8, 128>}, {transform_indices = @transform_1, window_bounds = array<i64: 128, 128>}, {pipeline_mode = #tpu.pipeline_mode<synchronous>, transform_indices = @transform_2, window_bounds = array<i64: 1, 128>}, {transform_indices = @transform_3, window_bounds = array<i64: 8, 128>}]} {
    %c0_i32 = arith.constant 0 : i32
    %0 = arith.cmpi eq, %arg1, %c0_i32 : i32
    %1 = arith.extui %0 : i1 to i32
    %c0_i32_0 = arith.constant 0 : i32
    %2 = arith.cmpi ne, %1, %c0_i32_0 : i32
    scf.if %2 {
      %cst_10 = arith.constant 0.000000e+00 : f32
      %12 = vector.broadcast %cst_10 : f32 to vector<8x128xf32>
      %c0_11 = arith.constant 0 : index
      %c0_12 = arith.constant 0 : index
      %13 = vector.load %arg6[%c0_11, %c0_12] : memref<8x128xf32, #tpu.memory_space<vmem>>, vector<8x128xf32>
      tpu.vector_store %arg6[%c0_11, %c0_12], %12 {strides = array<i32>} : memref<8x128xf32, #tpu.memory_space<vmem>>, vector<8x128xf32>,
    } else {
    }
    %c0 = arith.constant 0 : index
    %c0_1 = arith.constant 0 : index
    %3 = vector.load %arg6[%c0, %c0_1] : memref<8x128xf32, #tpu.memory_space<vmem>>, vector<8x128xf32>
    %c0_2 = arith.constant 0 : index
    %c0_3 = arith.constant 0 : index
    %4 = vector.load %arg2[%c0_2, %c0_3] : memref<8x128xf32, #tpu.memory_space<vmem>>, vector<8x128xf32>
    %c0_4 = arith.constant 0 : index
    %c0_5 = arith.constant 0 : index
    %5 = vector.load %arg3[%c0_4, %c0_5] : memref<128x128xf32, #tpu.memory_space<vmem>>, vector<128x128xf32>
    %cst = arith.constant dense<0.000000e+00> : vector<8x128xf32>
    %6 = tpu.matmul %4, %5, %cst {dimension_numbers = #tpu.dot_dimension_numbers<[1], [0], [0], [1], [0, 0, 1, 1], [], []>} : vector<8x128xf32>, vector<128x128xf32>, vector<8x128xf32> -> vector<8x128xf32>
    %7 = arith.addf %3, %6 : vector<8x128xf32>
    %c0_6 = arith.constant 0 : index
    %c0_7 = arith.constant 0 : index
    %8 = vector.load %arg6[%c0_6, %c0_7] : memref<8x128xf32, #tpu.memory_space<vmem>>, vector<8x128xf32>
    tpu.vector_store %arg6[%c0_6, %c0_7], %7 {strides = array<i32>} : memref<8x128xf32, #tpu.memory_space<vmem>>, vector<8x128xf32>,
    %c0_i32_8 = arith.constant 0 : i32
    %9 = arith.cmpi eq, %arg1, %c0_i32_8 : i32
    %10 = arith.extui %9 : i1 to i32
    %c0_i32_9 = arith.constant 0 : i32
    %11 = arith.cmpi ne, %10, %c0_i32_9 : i32
    scf.if %11 {
      %c0_10 = arith.constant 0 : index
      %c0_11 = arith.constant 0 : index
      %12 = vector.load %arg6[%c0_10, %c0_11] : memref<8x128xf32, #tpu.memory_space<vmem>>, vector<8x128xf32>
      %c0_12 = arith.constant 0 : index
      %c0_13 = arith.constant 0 : index
      %13 = vector.load %arg4[%c0_12, %c0_13] : memref<1x128xf32, #tpu.memory_space<vmem>>, vector<1x128xf32>
      %14 = vector.broadcast %13 : vector<1x128xf32> to vector<8x128xf32>
      %15 = arith.addf %12, %14 : vector<8x128xf32>
      %cst_14 = arith.constant dense<0xFF800000> : vector<8xf32>
      %16 = vector.multi_reduction <maximumf>, %15, %cst_14 [1] : vector<8x128xf32> to vector<8xf32>
      %17 = vector.shape_cast %16 : vector<8xf32> to vector<8x1xf32>
      %18 = vector.broadcast %17 : vector<8x1xf32> to vector<8x128xf32>
      %19 = arith.subf %15, %18 : vector<8x128xf32>
      %20 = math.exp %19 : vector<8x128xf32>
      %cst_15 = arith.constant dense<0.000000e+00> : vector<8xf32>
      %21 = vector.multi_reduction <add>, %20, %cst_15 [1] : vector<8x128xf32> to vector<8xf32>
      %22 = vector.shape_cast %21 : vector<8xf32> to vector<8x1xf32>
      %23 = vector.broadcast %22 : vector<8x1xf32> to vector<8x128xf32>
      %24 = arith.divf %20, %23 : vector<8x128xf32>
      %c0_16 = arith.constant 0 : index
      %c0_17 = arith.constant 0 : index
      %25 = vector.load %arg5[%c0_16, %c0_17] : memref<8x128xf32, #tpu.memory_space<vmem>>, vector<8x128xf32>
      tpu.vector_store %arg5[%c0_16, %c0_17], %24 {strides = array<i32>} : memref<8x128xf32, #tpu.memory_space<vmem>>, vector<8x128xf32>,
    } else {
    }
    return
  }
  func.func @transform_0(%arg0: i32, %arg1: i32) -> (i32, i32) {
    %c0_i32 = arith.constant 0 : i32
    return %arg0, %arg1 : i32, i32
  }
  func.func @transform_1(%arg0: i32, %arg1: i32) -> (i32, i32) {
    %c0_i32 = arith.constant 0 : i32
    %c0_i32_0 = arith.constant 0 : i32
    return %arg1, %c0_i32 : i32, i32
  }
  func.func @transform_2(%arg0: i32, %arg1: i32) -> (i32, i32) {
    %c0_i32 = arith.constant 0 : i32
    %c0_i32_0 = arith.constant 0 : i32
    %c0_i32_1 = arith.constant 0 : i32
    return %c0_i32, %c0_i32_0 : i32, i32
  }
  func.func @transform_3(%arg0: i32, %arg1: i32) -> (i32, i32) {
    %c0_i32 = arith.constant 0 : i32
    %c0_i32_0 = arith.constant 0 : i32
    return %arg0, %c0_i32 : i32, i32
  }
}

</mosaic_0001>

<bundles_post_ra>
// kernel: network_forward.1
= control target key start
LH: loop header
LB: loop body
LE: loop exit
PB: predicated region body
PF: predicated region fallthrough
CT: control target
= control target key end

     0   :  { %v194_v0 = vmov 0.0   ;;  %vm195_vm0 = vmmov 0   ;;  %s273_s1 = inlined_call_operand.vmem [shape: f32[128,128], index: 1, kind: input, shape index: {}]   ;;  %s274_s0 = inlined_call_operand.vmem [shape: f32[8,128], index: 0, kind: input, shape index: {}]   ;;  %s275_s2 = inlined_call_operand.vmem [shape: f32[1,128], index: 2, kind: input, shape index: {}]   ;;  %s276_s3 = inlined_call_operand.vmem [shape: f32[8,128], index: 3, kind: output, shape index: {}]  }
   0x1   :  { %153 = vmatprep.subr.mxu0 %v194_v0  ;;  %v36_v1 = vld [vmem:[%s273_s1 + $0x78] sm:$0xff]  ;;  %v35_v2 = vld [vmem:[%s273_s1 + $0x70] sm:$0xff]  ;;  %185 = vmatprep.mubr.msk.f32.mxu0 %vm195_vm0, %v194_v0  ;;  %v34_v3 = vld [vmem:[%s273_s1 + $0x68] sm:$0xff] }
   0x2   :  { %154 = vmatpush3.msra.mxu0 %v36_v1  ;;  %v33_v4 = vld [vmem:[%s273_s1 + $0x60] sm:$0xff]  ;;  %v32_v5 = vld [vmem:[%s273_s1 + $0x58] sm:$0xff]  ;;  %v31_v6 = vld [vmem:[%s273_s1 + $0x50] sm:$0xff] }
   0x3   :  { %155 = vmatprep.subr.mxu0 %v194_v0  ;;  %v30_v7 = vld [vmem:[%s273_s1 + $0x48] sm:$0xff]  ;;  %v29_v8 = vld [vmem:[%s273_s1 + $0x40] sm:$0xff]  ;;  %v28_v9 = vld [vmem:[%s273_s1 + $0x38] sm:$0xff] }
   0x4   :  { %156 = vmatpush3.msra.mxu0 %v35_v2  ;;  %v27_v10 = vld [vmem:[%s273_s1 + $0x30] sm:$0xff]  ;;  %v26_v11 = vld [vmem:[%s273_s1 + $0x28] sm:$0xff]  ;;  %v25_v12 = vld [vmem:[%s273_s1 + $0x20] sm:$0xff] }
   0x5   :  { %157 = vmatprep.subr.mxu0 %v194_v0  ;;  %v24_v13 = vld [vmem:[%s273_s1 + $0x18] sm:$0xff]  ;;  %v23_v14 = vld [vmem:[%s273_s1 + $0x10] sm:$0xff]  ;;  %v22_v15 = vld [vmem:[%s273_s1 + $0x8] sm:$0xff] }
   0x6   :  { %158 = vmatpush3.msra.mxu0 %v34_v3  ;;  %v21_v16 = vld [vmem:[%s273_s1] sm:$0xff] }
   0x7   :  { %159 = vmatprep.subr.mxu0 %v194_v0  ;;  %v20_v17 = vld [vmem:[%s274_s0] sm:$0xff] }
   0x8   :  { %160 = vmatpush3.msra.mxu0 %v33_v4  ;;  %v135_v18 = vld [vmem:[%s275_s2] ss:$0 sm:$0xff] }
   0x9   :  { %161 = vmatprep.subr.mxu0 %v194_v0 }
   0xa   :  { %162 = vmatpush3.msra.mxu0 %v32_v5 }
   0xb   :  { %163 = vmatprep.subr.mxu0 %v194_v0 }
   0xc   :  { %164 = vmatpush3.msra.mxu0 %v31_v6 }
   0xd   :  { %165 = vmatprep.subr.mxu0 %v194_v0 }
   0xe   :  { %166 = vmatpush3.msra.mxu0 %v30_v7 }
   0xf   :  { %167 = vmatprep.subr.mxu0 %v194_v0 }
  0x10   :  { %168 = vmatpush3.msra.mxu0 %v29_v8 }
  0x11   :  { %169 = vmatprep.subr.mxu0 %v194_v0 }
  0x12   :  { %170 = vmatpush3.msra.mxu0 %v28_v9 }
  0x13   :  { %171 = vmatprep.subr.mxu0 %v194_v0 }
  0x14   :  { %172 = vmatpush3.msra.mxu0 %v27_v10 }
  0x15   :  { %173 = vmatprep.subr.mxu0 %v194_v0 }
  0x16   :  { %174 = vmatpush3.msra.mxu0 %v26_v11 }
  0x17   :  { %175 = vmatprep.subr.mxu0 %v194_v0 }
  0x18   :  { %176 = vmatpush3.msra.mxu0 %v25_v12 }
  0x19   :  { %177 = vmatprep.subr.mxu0 %v194_v0 }
  0x1a   :  { %178 = vmatpush3.msra.mxu0 %v24_v13 }
  0x1b   :  { %179 = vmatprep.subr.mxu0 %v194_v0 }
  0x1c   :  { %180 = vmatpush3.msra.mxu0 %v23_v14 }
  0x1d   :  { %181 = vmatprep.subr.mxu0 %v194_v0 }
  0x1e   :  { %182 = vmatpush3.msra.mxu0 %v22_v15 }
  0x1f   :  { %183 = vmatprep.subr.mxu0 %v194_v0 }
  0x20   :  { %184 = vmatpush3.msra.mxu0 %v21_v16 }
  0x21   :  { %186 = vmatmul.mubr.f32.vlgmr.msra.gmra.mxu0 %v20_v17 }
  0xe1   :  { %v103_v19 = vpop.f32.mrf.mxu0 }
  0xe2   :  { %v120_v20 = vadd.f32 %v135_v18, %v103_v19 }
  0xe3   :  { %v187_v21 = vpop.f32.mrf.mxu0 }
  0xe4   :  { %121 = vmax.xlane.f32.xlu0 %v120_v20 }
 0x16d   :  { %v122_v22 = vpop.xlane.xlu0 %121 }
 0x16e   :  { %v123_v23 = vsub.f32 %v120_v20, %v122_v22 }
 0x170   :  { %v124_v24 = vmul.f32 1.442695, %v123_v23 }
 0x172   :  { %190 = vpow2.f32 %v124_v24 }
 0x17f   :  { %v191_v25 = vpop.eup %190 }
 0x180   :  { %126 = vadd.xlane.f32.xlu0 %v191_v25 }
 0x209   :  { %v127_v26 = vpop.xlane.xlu0 %126 }
 0x20a   :  { %192 = vrcp.f32 %v127_v26 }
 0x217   :  { %v193_v27 = vpop.eup %192 }
 0x218   :  { %v129_v28 = vmul.f32 %v193_v27, %v191_v25 }
 0x21a   :  { %130 = vst [vmem:[%s276_s3] sm:$0xff] %v129_v28 }

</bundles_post_ra>
